<compile_context>
chip_gen: v7x
topology: tpu7x:2x2x1
jax: 0.10.0
libtpu: 0.0.40
codegen_flags: <defaults>
</compile_context>

<pallas_src>
import jax
import jax.numpy as jnp
from jax.experimental import pallas as pl
from jax.experimental.pallas import tpu as pltpu


def _round_up(n, m):
    return ((n + m - 1) // m) * m


# ---------------------------------------------------------------------------
# Kernels
# ---------------------------------------------------------------------------

def _fused_kernel_resident_w(x_ref, w_ref, b_ref, o_ref):
    """out = GELU(x @ W + b) + x ; whole bf16 W resident in VMEM (grid over M)."""
    x = x_ref[...]                                         # (TM, H) f32, residual src
    h = jnp.dot(x.astype(jnp.bfloat16), w_ref[...],        # MXU, f32 accumulation
                preferred_element_type=jnp.float32)        # (TM, H) f32
    h = jax.nn.gelu(h + b_ref[...], approximate=True)      # bias + tanh GELU (EUP)
    o_ref[...] = (h + x).astype(o_ref.dtype)               # residual add in f32


def _fused_kernel_ntiled(xk_ref, xres_ref, w_ref, b_ref, o_ref):
    """Column-tiled variant for large H: W streamed as (H, TN) slabs."""
    h = jnp.dot(xk_ref[...].astype(jnp.bfloat16), w_ref[...],
                preferred_element_type=jnp.float32)         # (TM, TN) f32
    h = jax.nn.gelu(h + b_ref[...], approximate=True)
    o_ref[...] = (h + xres_ref[...]).astype(o_ref.dtype)    # residual column tile


# ---------------------------------------------------------------------------
# Tiling heuristics
# ---------------------------------------------------------------------------

def _pick_tn(H, tn=None):
    if tn is not None:
        return tn
    if H <= 1024:
        return H                       # whole W resident (<= 2 MiB bf16)
    for cand in (1024, 512, 256):      # multiples of 256 feed the 2x256 MXU (v6e/v7x)
        if H % cand == 0:
            return cand
    return H                           # odd H: keep whole W resident


def _pick_tm(M, H):
    # f32 x/out double buffers cost ~16*tm*H bytes; halve tm once H reaches 2K
    # so W still fits under a v7x-sized (64 MiB) VMEM budget.
    tm = 512 if H < 2048 else 256
    if M <= tm:
        # >= 2 row tiles so both v7x TensorCores get work and the DMA pipelines.
        tm = max(8, _round_up(pl.cdiv(M, 2), 8))
    return tm


def _vmem_limit_bytes(tm, tn, H, grid_n, out_itemsize):
    x_buf = 2 * tm * H * 4                       # double-buffered f32 x rows
    out_buf = 2 * tm * tn * out_itemsize         # double-buffered output tiles
    if grid_n == 1:
        w_buf = H * tn * 2                       # resident bf16 W, single buffer
        b_buf = tn * 4
        xres_buf = 0
    else:
        w_buf = 2 * H * tn * 2                   # streamed bf16 W slabs (double buf)
        b_buf = 2 * tn * 4
        xres_buf = 2 * tm * tn * 4               # residual column tiles
    total = x_buf + out_buf + w_buf + b_buf + xres_buf
    total += 4 * 1024 * 1024                     # Mosaic internal scratch headroom
    return int(min(max(total, 16 * 1024 * 1024), 128 * 1024 * 1024))


# ---------------------------------------------------------------------------
# Wrapper
# ---------------------------------------------------------------------------

def residual_add_dec1(X, w, b, *, tn=None, out_dtype=None):
    """JAX/Pallas equivalent of ResidualAdd_Dec1.forward.

    X = (x, y) with x: [B, S, H], y: arbitrary (passed through unchanged).
    Returns (fn(x) + x, y) with fn = Linear(H, H) + GELU fused in one kernel.
    `out_dtype=jnp.bfloat16` halves the HBM write stream when the surrounding
    residual stream is bf16 (the kernel is HBM-bound at moderate H).
    """
    x, y = X[0], X[1]
    B, S, H = x.shape
    M = B * S
    x2d = x.reshape(M, H)

    if b.ndim == 1:                     # PyTorch Linear bias is (H,)
        b = b.reshape(1, H)
    out_dtype = x.dtype if out_dtype is None else out_dtype
    out_itemsize = jnp.dtype(out_dtype).itemsize

    tn = _pick_tn(H, tn)
    tm = _pick_tm(M, H)
    grid_m = pl.cdiv(M, tm)
    grid_n = pl.cdiv(H, tn)

    # bf16 weight: half the DMA + half the VMEM footprint; matmul accumulates f32.
    w_bf16 = w.astype(jnp.bfloat16)
    b_f32 = b.astype(jnp.float32)

    if grid_n == 1:
        # W / b are VMEM-resident for the whole grid: constant index_map and
        # single buffering so they are not double-allocated.
        grid_spec = pltpu.PrefetchScalarGridSpec(
            num_scalar_prefetch=0,
            grid=(grid_m,),
            in_specs=[
                pl.BlockSpec((tm, H), lambda i: (i, 0)),                 # x rows (pipelined)
                pl.BlockSpec((H, H), lambda i: (0, 0),
                             pipeline_mode=pl.Buffered(1)),              # resident W
                pl.BlockSpec((1, H), lambda i: (0, 0),
                             pipeline_mode=pl.Buffered(1)),              # resident b
            ],
            out_specs=pl.BlockSpec((tm, H), lambda i: (i, 0)),
        )
        kernel = _fused_kernel_resident_w
        operands = (x2d, w_bf16, b_f32)
        dim_sem = ("parallel",)
    else:
        # Large-H path: columns streamed, rows parallel, j is the inner axis so
        # the full-K x row tile is reused (not re-DMA'd) across column steps.
        grid_spec = pltpu.PrefetchScalarGridSpec(
            num_scalar_prefetch=0,
            grid=(grid_m, grid_n),
            in_specs=[
                pl.BlockSpec((tm, H), lambda i, j: (i, 0)),    # full-K rows (matmul)
                pl.BlockSpec((tm, tn), lambda i, j: (i, j)),   # residual column tile
                pl.BlockSpec((H, tn), lambda i, j: (0, j)),    # streamed W slab
                pl.BlockSpec((1, tn), lambda i, j: (0, j)),    # bias slab
            ],
            out_specs=pl.BlockSpec((tm, tn), lambda i, j: (i, j)),
        )
        kernel = _fused_kernel_ntiled
        operands = (x2d, x2d, w_bf16, b_f32)
        dim_sem = ("parallel", "arbitrary")

    out2d = pl.pallas_call(
        kernel,
        out_shape=jax.ShapeDtypeStruct((M, H), out_dtype),
        grid_spec=grid_spec,
        compiler_params=pltpu.CompilerParams(
            dimension_semantics=dim_sem,
            vmem_limit_bytes=_vmem_limit_bytes(tm, tn, H, grid_n, out_itemsize),
        ),
    )(*operands)

    return out2d.reshape(B, S, H), y


# ---------------------------------------------------------------------------
# Smoke tests
# ---------------------------------------------------------------------------

if __name__ == "__main__":
    key = jax.random.PRNGKey(0)
    k_x, k_y, k_w, k_b, k_x2, k_w2, k_b2 = jax.random.split(key, 7)

    # ---- Test 1: toy residual block (resident-W path). H=32 is correctness
    # only — benchmark with H a multiple of 128 (lane-dense stores, full MXU).
    B, S, H = 2, 8, 32
    x = jax.random.normal(k_x, (B, S, H), dtype=jnp.float32)
    y = jax.random.normal(k_y, (B, S), dtype=jnp.float32)      # passthrough payload
    bound = 1.0 / (H ** 0.5)
    w = jax.random.uniform(k_w, (H, H), jnp.float32, -bound, bound)
    b = jax.random.uniform(k_b, (H,), jnp.float32, -bound, bound)   # PyTorch (H,) bias

    out_x, out_y = residual_add_dec1((x, y), w, b)
    jax.block_until_ready(out_x)
    jax.block_until_ready(out_y)

    h_ref = jnp.dot(x.reshape(B * S, H).astype(jnp.bfloat16),
                    w.astype(jnp.bfloat16),
                    preferred_element_type=jnp.float32).reshape(B, S, H)
    ref = jax.nn.gelu(h_ref + b, approximate=True) + x
    assert jnp.allclose(out_x, ref, atol=2e-3, rtol=2e-3), "mismatch vs reference (resident)"
    assert (out_y == y).all(), "y must pass through unchanged"

    # ---- Test 2: force tn=128 to exercise the column-tiled (streamed-W) path
    # cheaply (in production this path triggers automatically for H > 1024).
    H2 = 256
    x2 = jax.random.normal(k_x2, (B, S, H2), dtype=jnp.float32)
    bound2 = 1.0 / (H2 ** 0.5)
    w2 = jax.random.uniform(k_w2, (H2, H2), jnp.float32, -bound2, bound2)
    b2 = jax.random.uniform(k_b2, (H2,), jnp.float32, -bound2, bound2)

    out_x2, _ = residual_add_dec1((x2, y), w2, b2, tn=128)
    jax.block_until_ready(out_x2)

    h2_ref = jnp.dot(x2.reshape(B * S, H2).astype(jnp.bfloat16),
                     w2.astype(jnp.bfloat16),
                     preferred_element_type=jnp.float32).reshape(B, S, H2)
    ref2 = jax.nn.gelu(h2_ref + b2, approximate=True) + x2
    assert jnp.allclose(out_x2, ref2, atol=2e-3, rtol=2e-3), "mismatch vs reference (ntiled)"

    print("KERNEL_OK")
</pallas_src>

<mosaic_0001>
module attributes {stable_mosaic.version = 11 : i64} {
  func.func @_fused_kernel_resident_w(%arg0: i32, %arg1: memref<8x32xf32, #tpu.memory_space<vmem>>, %arg2: memref<32x32xbf16, #tpu.memory_space<vmem>>, %arg3: memref<1x32xf32, #tpu.memory_space<vmem>>, %arg4: memref<8x32xf32, #tpu.memory_space<vmem>>) attributes {dimension_semantics = [#tpu.dimension_semantics<parallel>], iteration_bounds = array<i64: 2>, scalar_prefetch = 0 : i64, scratch_operands = 0 : i64, tpu.core_type = #tpu.core_type<tc>, window_params = [{transform_indices = @transform_0, window_bounds = array<i64: 8, 32>}, {pipeline_mode = #tpu.pipeline_mode<synchronous>, transform_indices = @transform_1, window_bounds = array<i64: 32, 32>}, {pipeline_mode = #tpu.pipeline_mode<synchronous>, transform_indices = @transform_2, window_bounds = array<i64: 1, 32>}, {transform_indices = @transform_3, window_bounds = array<i64: 8, 32>}]} {
    %c0 = arith.constant 0 : index
    %c0_0 = arith.constant 0 : index
    %0 = vector.load %arg1[%c0, %c0_0] : memref<8x32xf32, #tpu.memory_space<vmem>>, vector<8x32xf32>
    %1 = arith.truncf %0 : vector<8x32xf32> to vector<8x32xbf16>
    %c0_1 = arith.constant 0 : index
    %c0_2 = arith.constant 0 : index
    %2 = vector.load %arg2[%c0_1, %c0_2] : memref<32x32xbf16, #tpu.memory_space<vmem>>, vector<32x32xbf16>
    %cst = arith.constant dense<0.000000e+00> : vector<8x32xf32>
    %3 = tpu.matmul %1, %2, %cst {dimension_numbers = #tpu.dot_dimension_numbers<[1], [0], [0], [1], [0, 0, 1, 1], [], []>} : vector<8x32xbf16>, vector<32x32xbf16>, vector<8x32xf32> -> vector<8x32xf32>
    %c0_3 = arith.constant 0 : index
    %c0_4 = arith.constant 0 : index
    %4 = vector.load %arg3[%c0_3, %c0_4] : memref<1x32xf32, #tpu.memory_space<vmem>>, vector<1x32xf32>
    %5 = vector.broadcast %4 : vector<1x32xf32> to vector<8x32xf32>
    %6 = arith.addf %3, %5 : vector<8x32xf32>
    %7 = arith.mulf %6, %6 : vector<8x32xf32>
    %8 = arith.mulf %6, %7 : vector<8x32xf32>
    %cst_5 = arith.constant 4.471500e-02 : f32
    %9 = vector.broadcast %cst_5 : f32 to vector<8x32xf32>
    %10 = arith.mulf %9, %8 : vector<8x32xf32>
    %11 = arith.addf %6, %10 : vector<8x32xf32>
    %cst_6 = arith.constant 0.797884583 : f32
    %12 = vector.broadcast %cst_6 : f32 to vector<8x32xf32>
    %13 = arith.mulf %12, %11 : vector<8x32xf32>
    %14 = math.tanh %13 : vector<8x32xf32>
    %cst_7 = arith.constant 1.000000e+00 : f32
    %15 = vector.broadcast %cst_7 : f32 to vector<8x32xf32>
    %16 = arith.addf %15, %14 : vector<8x32xf32>
    %cst_8 = arith.constant 5.000000e-01 : f32
    %17 = vector.broadcast %cst_8 : f32 to vector<8x32xf32>
    %18 = arith.mulf %17, %16 : vector<8x32xf32>
    %19 = arith.mulf %6, %18 : vector<8x32xf32>
    %20 = arith.addf %19, %0 : vector<8x32xf32>
    %c0_9 = arith.constant 0 : index
    %c0_10 = arith.constant 0 : index
    %21 = vector.load %arg4[%c0_9, %c0_10] : memref<8x32xf32, #tpu.memory_space<vmem>>, vector<8x32xf32>
    tpu.vector_store %arg4[%c0_9, %c0_10], %20 {strides = array<i32>} : memref<8x32xf32, #tpu.memory_space<vmem>>, vector<8x32xf32>,
    return
  }
  func.func @transform_0(%arg0: i32) -> (i32, i32) {
    %c0_i32 = arith.constant 0 : i32
    %c0_i32_0 = arith.constant 0 : i32
    return %arg0, %c0_i32 : i32, i32
  }
  func.func @transform_1(%arg0: i32) -> (i32, i32) {
    %c0_i32 = arith.constant 0 : i32
    %c0_i32_0 = arith.constant 0 : i32
    %c0_i32_1 = arith.constant 0 : i32
    return %c0_i32, %c0_i32_0 : i32, i32
  }
  func.func @transform_2(%arg0: i32) -> (i32, i32) {
    %c0_i32 = arith.constant 0 : i32
    %c0_i32_0 = arith.constant 0 : i32
    %c0_i32_1 = arith.constant 0 : i32
    return %c0_i32, %c0_i32_0 : i32, i32
  }
  func.func @transform_3(%arg0: i32) -> (i32, i32) {
    %c0_i32 = arith.constant 0 : i32
    %c0_i32_0 = arith.constant 0 : i32
    return %arg0, %c0_i32 : i32, i32
  }
}

</mosaic_0001>

<bundles_post_ra>
// kernel: tpu_custom_call.1
= control target key start
LH: loop header
LB: loop body
LE: loop exit
PB: predicated region body
PF: predicated region fallthrough
CT: control target
= control target key end

     0   :  { %8 = vsyncpa [#allocation3], 0  ;;  %s832_s0 = inlined_call_operand.hbm [shape: f32[16,32], index: 0, kind: input, shape index: {}]   ;;  %s833_s1 = inlined_call_operand.hbm [shape: bf16[32,32], index: 1, kind: input, shape index: {}]   ;;  %s834_s2 = inlined_call_operand.vmem [shape: f32[1,32], index: 2, kind: input, shape index: {}]   ;;  %s835_s3 = inlined_call_operand.hbm [shape: f32[16,32], index: 3, kind: output, shape index: {}]  }
   0x1   :  { %10 = vsyncpa [#allocation3 + $0x1], 0 }
   0x2   :  { %11 = vsyncpa [#allocation6], 0 }
   0x3   :  { %12 = vsyncpa [#allocation4], 0 }
   0x4   :  { %14 = vsyncpa [#allocation4 + $0x1], 0  ;;  %s627_s12 = smov 0   ;;  %s629_s13 = smov 0  }
   0x5   :  { %s631_s14 = smov 0   ;;  %s633_s15 = smov 0  }
   0x6 LB: > { %s648_s16 = sadd.s32 4294967295, %s598_s15   ;;  %s376_s17 = sadd.s32 4294967294, %s598_s15   ;;  %s598_s15 = sphi %s633_s15, %s855_s15   ;;  %s594_s14 = sphi %s631_s14, %s854_s14   ;;  %s590_s13 = sphi %s629_s13, %s853_s13   ;;  %s586_s12 = sphi %s627_s12, %s852_s12  }
   0x7   : > { %p40_p0 = scmp.ne.s32.totalorder %s590_s13, %s586_s12  ;;  %p836_p1 = scmp.eq.s32.totalorder %s648_s16, 0 }
   0x8   : > { %p112_p3 = scmp.eq.s32.totalorder %s376_s17, 1  ;;  %p377_p5 = scmp.ge.s32.totalorder %s598_s15, 1 }
   0x9   : > { %p657_p4 = por %p836_p1, %p40_p0  ;;  %p119_p7 = scmp.lt.s32.totalorder %s598_s15, 3 }
   0xa   : > { %p662_p6 = por %p112_p3, %p40_p0  ;;  %s600_s21 = smov [#allocation5]  }
   0xb   : > { %s839_s18 = scalar_select %p657_p4, 1, 0 }
   0xc   : > { %s840_s19 = scalar_select %p662_p6, 1, 0 }
   0xd   : > { %p667_p8 = pnand %p377_p5, %p119_p7  ;;  %s131_s22 = sshll.u32 %s600_s21, 4  ;;  %s671_s22 = int_to_ptr.vmem [resolvable:$true] %s131_s22 }
   0xe   : > { %s683_s24 = sadd.s32 1, %s598_s15   ;;  %s27_s25 = sadd.s32 1, %s594_s14 }
   0xf   : > { %s841_s20 = scalar_select %p667_p8, 1, 0 }
  0x10   : > { %p413_p9 = pneg %p667_p8  ;;  %s24_s26 = ssub.s32 %s598_s15, %s683_s24 }
  0x11   : > { %s470_s29 = scalar_lea.hbm %s833_s1, 256 }
  0x12   : > { %p678_p11 = pnand %p413_p9, %p836_p1  ;;  %p471_p12 = scmp.ne.s32.totalorder %s833_s1, %s470_s29 }
  0x13   : > { %p477_p5 = scmp.lt.u32.totalorder %s470_s29, %s833_s1 }
  0x14   : > { %p472_p13 = pneg %p678_p11 }
  0x16   : > { %p473_p0 = pnand %p472_p13, %p471_p12 }
  0x18   : > { %p474_p3 = pneg %p473_p0 }
  0x1a   : > { %p479_p7 = pnand %p477_p5, %p474_p3 }
  0x1c   : > { %482 = shalt.err (!%p479_p7)
}
  0x1d   : > { %s483_s7 = scalar_lea.vmem %s671_s22, 256  ;;  %p491_p2 = scmp.lt.s32.totalorder %s671_s22, %s671_s22 }
  0x1e   : > { %p484_p9 = scmp.ne.s32.totalorder %s671_s22, %s483_s7  ;;  %p492_p6 = scmp.lt.s32.totalorder %s483_s7, %s483_s7 }
  0x20   : > { %p486_p10 = pnand %p484_p9, %p472_p13  ;;  %p493_p4 = por %p492_p6, %p491_p2 }
  0x22   : > { %p487_p1 = pneg %p486_p10 }
  0x24   : > { %p494_p8 = pnand %p493_p4, %p487_p1 }
  0x26   : > { %497 = shalt.err (!%p494_p8)
}
  0x27   : > { %s601_s8 = smov 64   ;;  %s602_s9 = smov 4  }
  0x28   : > { %416 = dma.hbm_to_vmem [thread:$0]  (!%p678_p11), %s833_s1, 256, %s671_s22, [#allocation6], %s601_s8, %s601_s8, %s602_s9  }
  0x29   : > { %p25_p2 = scmp.eq.s32.totalorder %s24_s26, 0  ;;  %p34_p1 = scmp.ne.s32.totalorder %s594_s14, %s590_s13 }
  0x2a   : > { %p35_p4 = scmp.eq.s32.totalorder %s598_s15, 0  ;;  %p426_p6 = scmp.lt.s32.totalorder %s598_s15, 2 }
  0x2b   : > { %s714_s17 = scalar_select %p25_p2, %s594_s14, %s27_s25  }
  0x2c   : > { %p36_p8 = por %p35_p4, %p34_p1  ;;  %p843_p10 = scmp.eq.s32.totalorder %s648_s16, 1 }
  0x2d   : > { %s148_s27 = sand.u32 1, %s594_s14   ;;  %s381_s28 = sshll.u32 %s598_s15, 7 }
  0x2e   : > { %p718_p12 = por %p843_p10, %p34_p1  ;;  %s380_s29 = sshll.u32 %s148_s27, 3 }
  0x2f   : > { %s727_s4 = scalar_lea.hbm %s832_s0, %s381_s28  ;;  %s152_s22 = scalar_lea.vmem [#allocation2], %s380_s29 }
  0x30   : > { %s159_s25 = sshll.u32 %s152_s22, 4  ;;  %p729_p11 = pnand %p426_p6, %p36_p8  ;;  %s733_s25 = int_to_ptr.vmem [resolvable:$true] %s159_s25 }
  0x31   : > { %s149_s5 = scalar_lea.sflag [#allocation3], %s148_s27  ;;  %s498_s6 = scalar_lea.hbm %s727_s4, 128 }
  0x32   : > { %p499_p13 = scmp.ne.s32.totalorder %s727_s4, %s498_s6  ;;  %p500_p0 = pneg %p729_p11 }
  0x33   : > { %s503_s9 = scalar_lea.hbm %s832_s0, 256  ;;  %p504_p7 = scmp.lt.u32.totalorder %s727_s4, %s832_s0 }
  0x34   : > { %p501_p3 = pnand %p500_p0, %p499_p13  ;;  %p505_p9 = scmp.lt.u32.totalorder %s503_s9, %s498_s6 }
  0x35   : > { %p507_p1 = scmp.lt.u32.totalorder %s498_s6, %s727_s4 }
  0x36   : > { %p502_p5 = pneg %p501_p3  ;;  %p506_p2 = por %p505_p9, %p504_p7 }
  0x38   : > { %p508_p4 = por %p507_p1, %p506_p2 }
  0x3a   : > { %p509_p6 = pnand %p508_p4, %p502_p5 }
  0x3c   : > { %512 = shalt.err (!%p509_p6)
}
  0x3d   : > { %s513_s27 = scalar_lea.vmem %s733_s25, 128  ;;  %s603_s28 = smov [#allocation2]  }
  0x3e   : > { %p514_p8 = scmp.ne.s32.totalorder %s733_s25, %s513_s27  ;;  %s518_s29 = sshll.u32 %s603_s28, 4  ;;  %s519_s29 = int_to_ptr.vmem [resolvable:$false] %s518_s29 }
  0x3f   : > { %s520_s23 = scalar_lea.vmem %s519_s29, 256  ;;  %p521_p3 = scmp.lt.s32.totalorder %s733_s25, %s519_s29 }
  0x40   : > { %p516_p10 = pnand %p514_p8, %p500_p0  ;;  %p522_p7 = scmp.lt.s32.totalorder %s520_s23, %s513_s27 }
  0x42   : > { %p517_p13 = pneg %p516_p10  ;;  %p523_p9 = por %p522_p7, %p521_p3 }
  0x44   : > { %p524_p2 = pnand %p523_p9, %p517_p13 }
  0x46   : > { %527 = shalt.err (!%p524_p2)
}
  0x47   : > { %420 = dma.hbm_to_vmem [thread:$0]  (!%p729_p11), %s727_s4, 128, %s733_s25, %s149_s5  }
  0x48   : > { %p846_p5 = scmp.ne.s32.totalorder %s841_s20, 0 }
  0x49   : > { %s763_s30 = sand.u32 (!%p846_p5), 1, %s590_s13   ;;  %p847_p0 = scmp.ne.s32.totalorder (!%p846_p5), %s839_s18, 0 }
  0x4a   : > { %168 = sbr.rel (%p846_p5) target bundleno = 351 (0x15f), region = 32  ;;  %s383_s22 = sshll.u32 (!%p846_p5), %s763_s30, 3 }
  0x4b   : > { %s171_s6 = scalar_lea.sflag (!%p846_p5), [#allocation3], %s763_s30  ;;  %s174_s7 = scalar_lea.vmem (!%p846_p5), [#allocation2], %s383_s22 }
  0x51   : > { %573 = dma.done.wait (%p847_p0), %s171_s6, 128  }
  0x52   : > { %575 = vsyncadd (%p847_p0), %s171_s6, 4294967168  ;;  %p848_p11 = scmp.eq.s32.totalorder %s648_s16, 0 }
  0x54   : > { %577 = dma.done.wait (%p848_p11), [#allocation6], 256   ;;  %p849_p1 = pmov %p848_p11 }
  0x55   : > { %v604_v0 = vmov 0.0   ;;  %vm605_vm0 = vmmov 0   ;;  %v466_v1 = vld [vmem:[#allocation5] sm:$0xff]   ;;  %v467_v2 = vld [vmem:[#allocation5 + $0x8] sm:$0xff]   ;;  %v202_v3 = vld [vmem:[%s174_s7] sm:$0xff]  ;;  %vm227_vm1 = vcmask 261120  }
  0x56   : > { %579 = vsyncadd (%p849_p1), [#allocation6], 4294967040  ;;  %397 = vmatprep.subr.bf16.mxu0 %v604_v0  ;;  %401 = vmatprep.mubr.msk.bf16.mxu0 %vm605_vm0, %v604_v0  ;;  %v203_v4 = vpack.c.bf16 %v202_v3, %v202_v3  ;;  %v386_v5 = vld [vmem:[%s834_s2] ss:$0 sm:$0xff]  ;;  %s391_s4 = sshll.u32 %s648_s16, 7  ;;  %s200_s25 = scalar_lea.vmem [#allocation7], %s383_s22 }
  0x57   : > { %398 = vmatpush3.bf16.msra.mxu0 %v466_v1  ;;  %s296_s26 = sshll.u32 %s200_s25, 4  ;;  %s787_s9 = scalar_lea.hbm %s835_s3, %s391_s4  ;;  %s789_s26 = int_to_ptr.vmem [resolvable:$true] %s296_s26 }
  0x58   : > { %399 = vmatprep.subr.bf16.mxu0 %v604_v0  ;;  %s283_s10 = scalar_lea.sflag [#allocation4], %s763_s30  ;;  %s528_s11 = scalar_lea.vmem %s789_s26, 128 }
  0x59   : > { %p529_p4 = scmp.ne.s32.totalorder %s789_s26, %s528_s11  ;;  %s606_s16 = smov [#allocation7]  }
  0x5a   : > { %s532_s27 = sshll.u32 %s606_s16, 4  ;;  %s533_s27 = int_to_ptr.vmem [resolvable:$false] %s532_s27 }
  0x5b   : > { %400 = vmatpush3.bf16.msra.mxu0 %v467_v2  ;;  %p530_p6 = pnand %p529_p4, %p718_p12  ;;  %s534_s28 = scalar_lea.vmem %s533_s27, 256 }
  0x5c   : > { %p535_p10 = scmp.lt.s32.totalorder %s789_s26, %s533_s27  ;;  %p536_p13 = scmp.lt.s32.totalorder %s534_s28, %s528_s11 }
  0x5d   : > { %p531_p8 = pneg %p530_p6 }
  0x5e   : > { %402 = vmatmul.mubr.msk.bf16.vlgmr.msra.gmra.mrb[0].mxu0 %vm227_vm1, %v203_v4  ;;  %p537_p3 = por %p536_p13, %p535_p10 }
  0x60   : > { %p538_p7 = pnand %p537_p3, %p531_p8 }
 0x131   : > { %v265_v6 = vpop.f32.mrb[0].mxu0 }
 0x132   : > { %v266_v7 = vadd.f32 %v386_v5, %v265_v6  ;;  %v403_v8 = vpop.f32.mrb[1].mxu0 }
 0x133   : > { %v268_v9 = vpop.f32.mrb[2].mxu0 }
 0x134   : > { %v271_v10 = vmul.f32 %v266_v7, %v266_v7  ;;  %v404_v11 = vpop.f32.mrb[3].mxu0 }
 0x136   : > { %v272_v12 = vmul.f32 %v271_v10, %v266_v7 }
 0x138   : > { %v273_v13 = vmul.f32 0.044715, %v272_v12 }
 0x13a   : > { %v274_v14 = vadd.f32 %v273_v13, %v266_v7 }
 0x13c   : > { %v275_v15 = vmul.f32 0.7978846, %v274_v14 }
 0x13e   : > { %468 = vtanh.f32 %v275_v15 }
 0x148   : > { %v469_v16 = vpop.eup %468 }
 0x149   : > { %v277_v17 = vadd.f32 1.0, %v469_v16 }
 0x14b   : > { %v278_v18 = vmul.f32 0.5, %v277_v17 }
 0x14d   : > { %v279_v19 = vmul.f32 %v278_v18, %v266_v7 }
 0x14f   : > { %v280_v20 = vadd.f32 %v279_v19, %v202_v3 }
 0x151   : > { %281 = vst.msk [vmem:[%s200_s25] sm:$0xff] %vm227_vm1, %v280_v20 }
 0x152   : > { %541 = shalt.err (!%p538_p7)
}
 0x153   : > { %s542_s29 = scalar_lea.hbm %s787_s9, 128  ;;  %s546_s22 = scalar_lea.hbm %s835_s3, 256 }
 0x154   : > { %p543_p9 = scmp.ne.s32.totalorder %s787_s9, %s542_s29  ;;  %p547_p0 = scmp.lt.u32.totalorder %s787_s9, %s835_s3 }
 0x155   : > { %p548_p11 = scmp.lt.u32.totalorder %s546_s22, %s542_s29  ;;  %p550_p4 = scmp.lt.u32.totalorder %s542_s29, %s787_s9 }
 0x156   : > { %p544_p2 = pnand %p543_p9, %p718_p12 }
 0x157   : > { %p549_p1 = por %p548_p11, %p547_p0 }
 0x158   : > { %p545_p5 = pneg %p544_p2 }
 0x159   : > { %p551_p6 = por %p550_p4, %p549_p1 }
 0x15b   : > { %p552_p8 = pnand %p551_p6, %p545_p5 }
 0x15d   : > { %555 = shalt.err (!%p552_p8)
}
 0x15e   : > { %411 = dma.vmem_to_hbm [thread:$0]  (%p718_p12), %s789_s26, 128, %s787_s9, %s283_s10  }
 0x15f PF: > { %s308_s18 = sand.u32 1, %s586_s12   ;;  %p850_p10 = scmp.ne.s32.totalorder %s840_s19, 0 }
 0x160   : > { %p851_p13 = scmp.ge.s32.totalorder %s598_s15, 2  ;;  %s309_s20 = scalar_lea.sflag [#allocation4], %s308_s18 }
 0x162   : > { %p422_p3 = pnand %p851_p13, %p850_p10 }
 0x164   : > { %581 = dma.done.wait (!%p422_p3), %s309_s20, 128  }
 0x165   : > { %583 = vsyncadd (!%p422_p3), %s309_s20, 4294967168  ;;  %p17_p7 = scmp.ge.s32.totalorder %s683_s24, 4   ;;  %s852_s12 = smov %s590_s13 }
 0x166   : > { %s853_s13 = smov %s594_s14  ;;  %s854_s14 = smov %s714_s17 }
 0x167   : > { %s855_s15 = smov %s683_s24  ;;  %19 = sbr.rel (!%p17_p7) target bundleno = 6 (0x6), region = 81 }
 0x16e   :  { %314 = vsyncpa [#allocation3], 1 }
 0x16f   :  { %316 = vsyncpa [#allocation3 + $0x1], 1 }
 0x170   :  { %317 = vsyncpa [#allocation6], 1 }
 0x171   :  { %318 = vsyncpa [#allocation4], 1 }
 0x172   :  { %320 = vsyncpa [#allocation4 + $0x1], 1 }

</bundles_post_ra>
